<compile_context>
chip_gen: v7x
topology: tpu7x:2x2x1
jax: 0.10.0
libtpu: 0.0.40
codegen_flags: <defaults>
</compile_context>

<pallas_src>
import functools

import jax
import jax.numpy as jnp
from jax import lax
from jax.experimental import pallas as pl
from jax.experimental.pallas import tpu as pltpu


# --------------------------- helpers -----------------------------------------


def _f32_block_bytes(shape):
    """VMEM footprint of one f32 block with (8,128) tiling of the last 2 dims."""
    s = list(shape)
    if len(s) >= 2:
        s[-2] = -(-s[-2] // 8) * 8
    s[-1] = -(-s[-1] // 128) * 128
    n = 1
    for d in s:
        n *= d
    return 4 * n


def _pick_cout_tile(cout):
    """Lane-dense Cout tile (128/256) when it divides; else keep Cout whole."""
    for tn in (256, 128):
        if cout % tn == 0:
            return tn
    return cout


def _pick_row_tile(ho, wo, c, max_bytes=4 * 2**20):
    """Output-row tile for the pool kernel (keeps the input block small)."""
    per_row = 4 * _f32_block_bytes((wo, c))  # 4 window phases per output row
    t = max(1, min(ho, max_bytes // max(per_row, 1)))
    while t > 1 and ho % t:
        t -= 1
    return t


# --------------------------- Pallas kernels ----------------------------------


def _conv3x3s2_kernel(p_ref, w_ref, b_ref, o_ref, *, ho, wo):
    """Fused 3x3 / stride-2 conv for one image and one Cout tile.

    p_ref: (1, 2, 2, ho+1, wo+1, C)  stride-2 phase view of the padded image:
                                     p[0, r, c, i, j, :] == xpad[2*i+r, 2*j+c, :]
    w_ref: (9, C, tn)                tap-major weight (tap index = kh*3 + kw)
    b_ref: (1, tn)
    o_ref: (1, ho*wo, tn)
    """
    c_in = p_ref.shape[5]
    tn = o_ref.shape[2]
    acc = jnp.zeros((ho * wo, tn), dtype=jnp.float32)
    for kh in range(3):
        r, dr = kh % 2, kh // 2
        for kw in range(3):
            c, dc = kw % 2, kw // 2
            # xpad[2*oh + kh, 2*ow + kw]  ==  p[r, c, oh + dr, ow + dc]
            tap = p_ref[0, r, c, dr:dr + ho, dc:dc + wo, :]          # (ho, wo, C)
            acc = acc + jnp.dot(tap.reshape(ho * wo, c_in),
                                w_ref[kh * 3 + kw],
                                preferred_element_type=jnp.float32)
    acc = acc + b_ref[...].astype(jnp.float32)
    o_ref[0] = acc.astype(o_ref.dtype)


def _avgpool2x2_kernel(p_ref, o_ref):
    """2x2 / stride-2 average pool on one (image, output-row-tile) block.

    p_ref: (1, 2, 2, th, wo, C)   p[0, r, c, i, j, :] == x[2*i+r, 2*j+c, :]
    o_ref: (1, th, wo, C)
    """
    s = (p_ref[0, 0, 0] + p_ref[0, 0, 1] + p_ref[0, 1, 0] + p_ref[0, 1, 1])
    o_ref[0] = (s * 0.25).astype(o_ref.dtype)


# ------------------------------ wrappers --------------------------------------


def conv_downsample(x_nchw, w_taps, bias, padding=1):
    """Conv2d(Cin, Cout, k=3, stride=2, padding) — PyTorch semantics (NCHW)."""
    N, C, H, W = x_nchw.shape
    Cout = w_taps.shape[2]
    Ho = (H + 2 * padding - 3) // 2 + 1
    Wo = (W + 2 * padding - 3) // 2 + 1
    Ht, Wt = 2 * (Ho + 1), 2 * (Wo + 1)          # >= H+2p; extra rows never read

    # Single pad + transpose pass: NCHW -> stride-2 phase layout
    # (N, 2, 2, Ho+1, Wo+1, C); keeps C lane-aligned and last-2 dims tileable.
    xpad = jnp.pad(x_nchw, ((0, 0), (0, 0),
                            (padding, Ht - H - padding),
                            (padding, Wt - W - padding)))
    phases = xpad.reshape(N, C, Ho + 1, 2, Wo + 1, 2).transpose(0, 3, 5, 2, 4, 1)

    tn = _pick_cout_tile(Cout)
    b2 = bias.reshape(1, Cout).astype(jnp.float32)

    in_block = (1, 2, 2, Ho + 1, Wo + 1, C)
    w_block = (9, C, tn)
    out_block = (1, Ho * Wo, tn)
    est = 2 * (_f32_block_bytes(in_block) + _f32_block_bytes(w_block)
               + _f32_block_bytes((1, tn)) + _f32_block_bytes(out_block))
    vmem_limit = int(min(48 * 2**20, max(32 * 2**20, est + (2 << 20))))

    out = pl.pallas_call(
        functools.partial(_conv3x3s2_kernel, ho=Ho, wo=Wo),
        out_shape=jax.ShapeDtypeStruct((N, Ho * Wo, Cout), x_nchw.dtype),
        grid=(N, Cout // tn),
        in_specs=[
            pl.BlockSpec(in_block, lambda n, j: (n, 0, 0, 0, 0, 0)),
            pl.BlockSpec(w_block, lambda n, j: (0, 0, j)),
            pl.BlockSpec((1, tn), lambda n, j: (0, j)),
        ],
        out_specs=pl.BlockSpec(out_block, lambda n, j: (n, 0, j)),
        compiler_params=pltpu.CompilerParams(
            dimension_semantics=("parallel", "parallel"),
            vmem_limit_bytes=vmem_limit),
    )(phases, w_taps, b2)

    out = out.reshape(N, Ho, Wo, Cout)
    # TODO(synk): skip this transpose if the surrounding model consumes NHWC.
    return jnp.transpose(out, (0, 3, 1, 2))                          # NCHW


def avgpool_downsample(x_nchw):
    """AvgPool2d(kernel_size=2, stride=2) — PyTorch semantics (NCHW)."""
    N, C, H, W = x_nchw.shape
    Ho, Wo = H // 2, W // 2                      # floor like PyTorch on odd H/W
    xc = x_nchw[:, :, :2 * Ho, :2 * Wo]
    # Single transpose pass: NCHW -> (N, 2, 2, Ho, Wo, C) window-phase layout.
    phases = xc.reshape(N, C, Ho, 2, Wo, 2).transpose(0, 3, 5, 2, 4, 1)

    th = _pick_row_tile(Ho, Wo, C)
    out = pl.pallas_call(
        _avgpool2x2_kernel,
        out_shape=jax.ShapeDtypeStruct((N, Ho, Wo, C), x_nchw.dtype),
        grid=(N, Ho // th),
        in_specs=[pl.BlockSpec((1, 2, 2, th, Wo, C),
                               lambda n, i: (n, 0, 0, i, 0, 0))],
        out_specs=pl.BlockSpec((1, th, Wo, C), lambda n, i: (n, i, 0, 0)),
        compiler_params=pltpu.CompilerParams(
            dimension_semantics=("parallel", "parallel")),
    )(phases)
    # TODO(synk): skip this transpose if the surrounding model consumes NHWC.
    return jnp.transpose(out, (0, 3, 1, 2))                          # NCHW


class Downsample:
    """Mirror of the PyTorch Downsample module (dims=2 path)."""

    def __init__(self, channels, use_conv, dims=2, out_channels=None,
                 padding=1, key=jax.random.PRNGKey(42)):
        # TODO(synk): dims==1 / dims==3 variants not implemented; only the
        #             dims==2 Conv2d / AvgPool2d path is wired here.
        assert dims == 2
        self.channels = channels
        self.out_channels = out_channels or channels
        self.use_conv = use_conv
        self.padding = padding
        if use_conv:
            kw_key, kb_key = jax.random.split(key)
            self.weight = 0.1 * jax.random.normal(
                kw_key, (self.out_channels, channels, 3, 3), jnp.float32)
            self.bias = 0.1 * jax.random.normal(
                kb_key, (self.out_channels,), jnp.float32)
            # Pre-reshape once at init: (Cout, Cin, 3, 3) -> (9, Cin, Cout),
            # tap-major (tap = kh*3 + kw) so the kernel indexes taps directly.
            self.w_taps = jnp.transpose(self.weight, (2, 3, 1, 0)).reshape(
                9, channels, self.out_channels)
        else:
            assert self.channels == self.out_channels

    def __call__(self, x):
        assert x.shape[1] == self.channels
        if self.use_conv:
            return conv_downsample(x, self.w_taps, self.bias, self.padding)
        return avgpool_downsample(x)


# ------------------------------- main -----------------------------------------

if __name__ == "__main__":
    key = jax.random.PRNGKey(0)
    N, C, H, W = 2, 4, 16, 16
    x = jax.random.normal(key, (N, C, H, W), jnp.float32)

    # ---- use_conv=True path ----
    ds_conv = Downsample(channels=C, use_conv=True, out_channels=C)
    y_conv = ds_conv(x)
    jax.block_until_ready(y_conv)

    # pure-JAX reference (PyTorch Conv2d semantics: NCHW / OIHW, stride 2, pad 1)
    y_ref = lax.conv_general_dilated(
        x, ds_conv.weight, window_strides=(2, 2), padding=[(1, 1), (1, 1)],
        dimension_numbers=("NCHW", "OIHW", "NCHW"),
    ) + ds_conv.bias.reshape(1, C, 1, 1)
    assert y_conv.shape == (N, C, H // 2, W // 2), y_conv.shape
    assert jnp.allclose(y_conv, y_ref, atol=1e-4, rtol=1e-4), "conv mismatch"

    # ---- use_conv=False path (AvgPool2d(2, 2)) ----
    ds_pool = Downsample(channels=C, use_conv=False)
    y_pool = ds_pool(x)
    jax.block_until_ready(y_pool)

    y_pool_ref = x.reshape(N, C, H // 2, 2, W // 2, 2).mean(axis=(3, 5))
    assert y_pool.shape == (N, C, H // 2, W // 2), y_pool.shape
    assert jnp.allclose(y_pool, y_pool_ref, atol=1e-5, rtol=1e-5), "pool mismatch"

    print("KERNEL_OK")
</pallas_src>

<mosaic_0001>
module attributes {stable_mosaic.version = 11 : i64} {
  func.func @_conv3x3s2_kernel(%arg0: i32, %arg1: i32, %arg2: memref<1x2x2x9x9x4xf32, #tpu.memory_space<vmem>>, %arg3: memref<9x4x4xf32, #tpu.memory_space<vmem>>, %arg4: memref<1x4xf32, #tpu.memory_space<vmem>>, %arg5: memref<1x64x4xf32, #tpu.memory_space<vmem>>) attributes {dimension_semantics = [#tpu.dimension_semantics<parallel>, #tpu.dimension_semantics<parallel>], iteration_bounds = array<i64: 2, 1>, scalar_prefetch = 0 : i64, scratch_operands = 0 : i64, tpu.core_type = #tpu.core_type<tc>, window_params = [{transform_indices = @transform_0, window_bounds = array<i64: 1, 2, 2, 9, 9, 4>}, {transform_indices = @transform_1, window_bounds = array<i64: 9, 4, 4>}, {transform_indices = @transform_2, window_bounds = array<i64: 1, 4>}, {transform_indices = @transform_3, window_bounds = array<i64: 1, 64, 4>}]} {
    %cst = arith.constant 0.000000e+00 : f32
    %0 = vector.broadcast %cst : f32 to vector<64x4xf32>
    %c0 = arith.constant 0 : index
    %c0_0 = arith.constant 0 : index
    %c0_1 = arith.constant 0 : index
    %c0_2 = arith.constant 0 : index
    %c0_3 = arith.constant 0 : index
    %c0_4 = arith.constant 0 : index
    %1 = vector.load %arg2[%c0, %c0_0, %c0_1, %c0_2, %c0_3, %c0_4] : memref<1x2x2x9x9x4xf32, #tpu.memory_space<vmem>>, vector<1x1x1x8x8x4xf32>
    %2 = vector.shape_cast %1 : vector<1x1x1x8x8x4xf32> to vector<8x8x4xf32>
    %3 = vector.shape_cast %2 : vector<8x8x4xf32> to vector<64x4xf32>
    %c0_5 = arith.constant 0 : index
    %c0_6 = arith.constant 0 : index
    %c0_7 = arith.constant 0 : index
    %4 = vector.load %arg3[%c0_5, %c0_6, %c0_7] : memref<9x4x4xf32, #tpu.memory_space<vmem>>, vector<1x4x4xf32>
    %5 = vector.shape_cast %4 : vector<1x4x4xf32> to vector<4x4xf32>
    %cst_8 = arith.constant dense<0.000000e+00> : vector<64x4xf32>
    %6 = tpu.matmul %3, %5, %cst_8 {dimension_numbers = #tpu.dot_dimension_numbers<[1], [0], [0], [1], [0, 0, 1, 1], [], []>} : vector<64x4xf32>, vector<4x4xf32>, vector<64x4xf32> -> vector<64x4xf32>
    %7 = arith.addf %0, %6 : vector<64x4xf32>
    %c0_9 = arith.constant 0 : index
    %c0_10 = arith.constant 0 : index
    %c1 = arith.constant 1 : index
    %c0_11 = arith.constant 0 : index
    %c0_12 = arith.constant 0 : index
    %c0_13 = arith.constant 0 : index
    %8 = vector.load %arg2[%c0_9, %c0_10, %c1, %c0_11, %c0_12, %c0_13] : memref<1x2x2x9x9x4xf32, #tpu.memory_space<vmem>>, vector<1x1x1x8x8x4xf32>
    %9 = vector.shape_cast %8 : vector<1x1x1x8x8x4xf32> to vector<8x8x4xf32>
    %10 = vector.shape_cast %9 : vector<8x8x4xf32> to vector<64x4xf32>
    %c1_14 = arith.constant 1 : index
    %c0_15 = arith.constant 0 : index
    %c0_16 = arith.constant 0 : index
    %11 = vector.load %arg3[%c1_14, %c0_15, %c0_16] : memref<9x4x4xf32, #tpu.memory_space<vmem>>, vector<1x4x4xf32>
    %12 = vector.shape_cast %11 : vector<1x4x4xf32> to vector<4x4xf32>
    %cst_17 = arith.constant dense<0.000000e+00> : vector<64x4xf32>
    %13 = tpu.matmul %10, %12, %cst_17 {dimension_numbers = #tpu.dot_dimension_numbers<[1], [0], [0], [1], [0, 0, 1, 1], [], []>} : vector<64x4xf32>, vector<4x4xf32>, vector<64x4xf32> -> vector<64x4xf32>
    %14 = arith.addf %7, %13 : vector<64x4xf32>
    %c0_18 = arith.constant 0 : index
    %c0_19 = arith.constant 0 : index
    %c0_20 = arith.constant 0 : index
    %c0_21 = arith.constant 0 : index
    %c1_22 = arith.constant 1 : index
    %c0_23 = arith.constant 0 : index
    %15 = vector.load %arg2[%c0_18, %c0_19, %c0_20, %c0_21, %c1_22, %c0_23] : memref<1x2x2x9x9x4xf32, #tpu.memory_space<vmem>>, vector<1x1x1x8x8x4xf32>
    %16 = vector.shape_cast %15 : vector<1x1x1x8x8x4xf32> to vector<8x8x4xf32>
    %17 = vector.shape_cast %16 : vector<8x8x4xf32> to vector<64x4xf32>
    %c2 = arith.constant 2 : index
    %c0_24 = arith.constant 0 : index
    %c0_25 = arith.constant 0 : index
    %18 = vector.load %arg3[%c2, %c0_24, %c0_25] : memref<9x4x4xf32, #tpu.memory_space<vmem>>, vector<1x4x4xf32>
    %19 = vector.shape_cast %18 : vector<1x4x4xf32> to vector<4x4xf32>
    %cst_26 = arith.constant dense<0.000000e+00> : vector<64x4xf32>
    %20 = tpu.matmul %17, %19, %cst_26 {dimension_numbers = #tpu.dot_dimension_numbers<[1], [0], [0], [1], [0, 0, 1, 1], [], []>} : vector<64x4xf32>, vector<4x4xf32>, vector<64x4xf32> -> vector<64x4xf32>
    %21 = arith.addf %14, %20 : vector<64x4xf32>
    %c0_27 = arith.constant 0 : index
    %c1_28 = arith.constant 1 : index
    %c0_29 = arith.constant 0 : index
    %c0_30 = arith.constant 0 : index
    %c0_31 = arith.constant 0 : index
    %c0_32 = arith.constant 0 : index
    %22 = vector.load %arg2[%c0_27, %c1_28, %c0_29, %c0_30, %c0_31, %c0_32] : memref<1x2x2x9x9x4xf32, #tpu.memory_space<vmem>>, vector<1x1x1x8x8x4xf32>
    %23 = vector.shape_cast %22 : vector<1x1x1x8x8x4xf32> to vector<8x8x4xf32>
    %24 = vector.shape_cast %23 : vector<8x8x4xf32> to vector<64x4xf32>
    %c3 = arith.constant 3 : index
    %c0_33 = arith.constant 0 : index
    %c0_34 = arith.constant 0 : index
    %25 = vector.load %arg3[%c3, %c0_33, %c0_34] : memref<9x4x4xf32, #tpu.memory_space<vmem>>, vector<1x4x4xf32>
    %26 = vector.shape_cast %25 : vector<1x4x4xf32> to vector<4x4xf32>
    %cst_35 = arith.constant dense<0.000000e+00> : vector<64x4xf32>
    %27 = tpu.matmul %24, %26, %cst_35 {dimension_numbers = #tpu.dot_dimension_numbers<[1], [0], [0], [1], [0, 0, 1, 1], [], []>} : vector<64x4xf32>, vector<4x4xf32>, vector<64x4xf32> -> vector<64x4xf32>
    %28 = arith.addf %21, %27 : vector<64x4xf32>
    %c0_36 = arith.constant 0 : index
    %c1_37 = arith.constant 1 : index
    %c1_38 = arith.constant 1 : index
    %c0_39 = arith.constant 0 : index
    %c0_40 = arith.constant 0 : index
    %c0_41 = arith.constant 0 : index
    %29 = vector.load %arg2[%c0_36, %c1_37, %c1_38, %c0_39, %c0_40, %c0_41] : memref<1x2x2x9x9x4xf32, #tpu.memory_space<vmem>>, vector<1x1x1x8x8x4xf32>
    %30 = vector.shape_cast %29 : vector<1x1x1x8x8x4xf32> to vector<8x8x4xf32>
    %31 = vector.shape_cast %30 : vector<8x8x4xf32> to vector<64x4xf32>
    %c4 = arith.constant 4 : index
    %c0_42 = arith.constant 0 : index
    %c0_43 = arith.constant 0 : index
    %32 = vector.load %arg3[%c4, %c0_42, %c0_43] : memref<9x4x4xf32, #tpu.memory_space<vmem>>, vector<1x4x4xf32>
    %33 = vector.shape_cast %32 : vector<1x4x4xf32> to vector<4x4xf32>
    %cst_44 = arith.constant dense<0.000000e+00> : vector<64x4xf32>
    %34 = tpu.matmul %31, %33, %cst_44 {dimension_numbers = #tpu.dot_dimension_numbers<[1], [0], [0], [1], [0, 0, 1, 1], [], []>} : vector<64x4xf32>, vector<4x4xf32>, vector<64x4xf32> -> vector<64x4xf32>
    %35 = arith.addf %28, %34 : vector<64x4xf32>
    %c0_45 = arith.constant 0 : index
    %c1_46 = arith.constant 1 : index
    %c0_47 = arith.constant 0 : index
    %c0_48 = arith.constant 0 : index
    %c1_49 = arith.constant 1 : index
    %c0_50 = arith.constant 0 : index
    %36 = vector.load %arg2[%c0_45, %c1_46, %c0_47, %c0_48, %c1_49, %c0_50] : memref<1x2x2x9x9x4xf32, #tpu.memory_space<vmem>>, vector<1x1x1x8x8x4xf32>
    %37 = vector.shape_cast %36 : vector<1x1x1x8x8x4xf32> to vector<8x8x4xf32>
    %38 = vector.shape_cast %37 : vector<8x8x4xf32> to vector<64x4xf32>
    %c5 = arith.constant 5 : index
    %c0_51 = arith.constant 0 : index
    %c0_52 = arith.constant 0 : index
    %39 = vector.load %arg3[%c5, %c0_51, %c0_52] : memref<9x4x4xf32, #tpu.memory_space<vmem>>, vector<1x4x4xf32>
    %40 = vector.shape_cast %39 : vector<1x4x4xf32> to vector<4x4xf32>
    %cst_53 = arith.constant dense<0.000000e+00> : vector<64x4xf32>
    %41 = tpu.matmul %38, %40, %cst_53 {dimension_numbers = #tpu.dot_dimension_numbers<[1], [0], [0], [1], [0, 0, 1, 1], [], []>} : vector<64x4xf32>, vector<4x4xf32>, vector<64x4xf32> -> vector<64x4xf32>
    %42 = arith.addf %35, %41 : vector<64x4xf32>
    %c0_54 = arith.constant 0 : index
    %c0_55 = arith.constant 0 : index
    %c0_56 = arith.constant 0 : index
    %c1_57 = arith.constant 1 : index
    %c0_58 = arith.constant 0 : index
    %c0_59 = arith.constant 0 : index
    %43 = vector.load %arg2[%c0_54, %c0_55, %c0_56, %c1_57, %c0_58, %c0_59] : memref<1x2x2x9x9x4xf32, #tpu.memory_space<vmem>>, vector<1x1x1x8x8x4xf32>
    %44 = vector.shape_cast %43 : vector<1x1x1x8x8x4xf32> to vector<8x8x4xf32>
    %45 = vector.shape_cast %44 : vector<8x8x4xf32> to vector<64x4xf32>
    %c6 = arith.constant 6 : index
    %c0_60 = arith.constant 0 : index
    %c0_61 = arith.constant 0 : index
    %46 = vector.load %arg3[%c6, %c0_60, %c0_61] : memref<9x4x4xf32, #tpu.memory_space<vmem>>, vector<1x4x4xf32>
    %47 = vector.shape_cast %46 : vector<1x4x4xf32> to vector<4x4xf32>
    %cst_62 = arith.constant dense<0.000000e+00> : vector<64x4xf32>
    %48 = tpu.matmul %45, %47, %cst_62 {dimension_numbers = #tpu.dot_dimension_numbers<[1], [0], [0], [1], [0, 0, 1, 1], [], []>} : vector<64x4xf32>, vector<4x4xf32>, vector<64x4xf32> -> vector<64x4xf32>
    %49 = arith.addf %42, %48 : vector<64x4xf32>
    %c0_63 = arith.constant 0 : index
    %c0_64 = arith.constant 0 : index
    %c1_65 = arith.constant 1 : index
    %c1_66 = arith.constant 1 : index
    %c0_67 = arith.constant 0 : index
    %c0_68 = arith.constant 0 : index
    %50 = vector.load %arg2[%c0_63, %c0_64, %c1_65, %c1_66, %c0_67, %c0_68] : memref<1x2x2x9x9x4xf32, #tpu.memory_space<vmem>>, vector<1x1x1x8x8x4xf32>
    %51 = vector.shape_cast %50 : vector<1x1x1x8x8x4xf32> to vector<8x8x4xf32>
    %52 = vector.shape_cast %51 : vector<8x8x4xf32> to vector<64x4xf32>
    %c7 = arith.constant 7 : index
    %c0_69 = arith.constant 0 : index
    %c0_70 = arith.constant 0 : index
    %53 = vector.load %arg3[%c7, %c0_69, %c0_70] : memref<9x4x4xf32, #tpu.memory_space<vmem>>, vector<1x4x4xf32>
    %54 = vector.shape_cast %53 : vector<1x4x4xf32> to vector<4x4xf32>
    %cst_71 = arith.constant dense<0.000000e+00> : vector<64x4xf32>
    %55 = tpu.matmul %52, %54, %cst_71 {dimension_numbers = #tpu.dot_dimension_numbers<[1], [0], [0], [1], [0, 0, 1, 1], [], []>} : vector<64x4xf32>, vector<4x4xf32>, vector<64x4xf32> -> vector<64x4xf32>
    %56 = arith.addf %49, %55 : vector<64x4xf32>
    %c0_72 = arith.constant 0 : index
    %c0_73 = arith.constant 0 : index
    %c0_74 = arith.constant 0 : index
    %c1_75 = arith.constant 1 : index
    %c1_76 = arith.constant 1 : index
    %c0_77 = arith.constant 0 : index
    %57 = vector.load %arg2[%c0_72, %c0_73, %c0_74, %c1_75, %c1_76, %c0_77] : memref<1x2x2x9x9x4xf32, #tpu.memory_space<vmem>>, vector<1x1x1x8x8x4xf32>
    %58 = vector.shape_cast %57 : vector<1x1x1x8x8x4xf32> to vector<8x8x4xf32>
    %59 = vector.shape_cast %58 : vector<8x8x4xf32> to vector<64x4xf32>
    %c8 = arith.constant 8 : index
    %c0_78 = arith.constant 0 : index
    %c0_79 = arith.constant 0 : index
    %60 = vector.load %arg3[%c8, %c0_78, %c0_79] : memref<9x4x4xf32, #tpu.memory_space<vmem>>, vector<1x4x4xf32>
    %61 = vector.shape_cast %60 : vector<1x4x4xf32> to vector<4x4xf32>
    %cst_80 = arith.constant dense<0.000000e+00> : vector<64x4xf32>
    %62 = tpu.matmul %59, %61, %cst_80 {dimension_numbers = #tpu.dot_dimension_numbers<[1], [0], [0], [1], [0, 0, 1, 1], [], []>} : vector<64x4xf32>, vector<4x4xf32>, vector<64x4xf32> -> vector<64x4xf32>
    %63 = arith.addf %56, %62 : vector<64x4xf32>
    %c0_81 = arith.constant 0 : index
    %c0_82 = arith.constant 0 : index
    %64 = vector.load %arg4[%c0_81, %c0_82] : memref<1x4xf32, #tpu.memory_space<vmem>>, vector<1x4xf32>
    %65 = vector.broadcast %64 : vector<1x4xf32> to vector<64x4xf32>
    %66 = arith.addf %63, %65 : vector<64x4xf32>
    %c0_83 = arith.constant 0 : index
    %c0_84 = arith.constant 0 : index
    %c0_85 = arith.constant 0 : index
    %67 = vector.load %arg5[%c0_83, %c0_84, %c0_85] : memref<1x64x4xf32, #tpu.memory_space<vmem>>, vector<1x64x4xf32>
    %68 = vector.shape_cast %67 : vector<1x64x4xf32> to vector<64x4xf32>
    %69 = vector.shape_cast %66 : vector<64x4xf32> to vector<1x64x4xf32>
    tpu.vector_store %arg5[%c0_83, %c0_84, %c0_85], %69 {strides = array<i32>} : memref<1x64x4xf32, #tpu.memory_space<vmem>>, vector<1x64x4xf32>,
    return
  }
  func.func @transform_0(%arg0: i32, %arg1: i32) -> (i32, i32, i32, i32, i32, i32) {
    %c0_i32 = arith.constant 0 : i32
    %c0_i32_0 = arith.constant 0 : i32
    %c0_i32_1 = arith.constant 0 : i32
    %c0_i32_2 = arith.constant 0 : i32
    %c0_i32_3 = arith.constant 0 : i32
    %c0_i32_4 = arith.constant 0 : i32
    return %arg0, %c0_i32, %c0_i32_0, %c0_i32_1, %c0_i32_2, %c0_i32_3 : i32, i32, i32, i32, i32, i32
  }
  func.func @transform_1(%arg0: i32, %arg1: i32) -> (i32, i32, i32) {
    %c0_i32 = arith.constant 0 : i32
    %c0_i32_0 = arith.constant 0 : i32
    %c0_i32_1 = arith.constant 0 : i32
    return %c0_i32, %c0_i32_0, %arg1 : i32, i32, i32
  }
  func.func @transform_2(%arg0: i32, %arg1: i32) -> (i32, i32) {
    %c0_i32 = arith.constant 0 : i32
    %c0_i32_0 = arith.constant 0 : i32
    return %c0_i32, %arg1 : i32, i32
  }
  func.func @transform_3(%arg0: i32, %arg1: i32) -> (i32, i32, i32) {
    %c0_i32 = arith.constant 0 : i32
    %c0_i32_0 = arith.constant 0 : i32
    return %arg0, %c0_i32, %arg1 : i32, i32, i32
  }
}

</mosaic_0001>

<bundles_post_ra>
// kernel: tpu_custom_call.1
= control target key start
LH: loop header
LB: loop body
LE: loop exit
PB: predicated region body
PF: predicated region fallthrough
CT: control target
= control target key end

     0   :  { %s2191_s12 = smov 0   ;;  %s2193_s13 = smov 0   ;;  %s2455_s0 = inlined_call_operand.vmem [shape: f32[2,2,2,9,9,4], index: 0, kind: input, shape index: {}]   ;;  %s2456_s1 = inlined_call_operand.vmem [shape: f32[9,4,4], index: 1, kind: input, shape index: {}]   ;;  %s2457_s2 = inlined_call_operand.vmem [shape: f32[1,4], index: 2, kind: input, shape index: {}]   ;;  %s2458_s3 = inlined_call_operand.vmem [shape: f32[2,64,4], index: 3, kind: output, shape index: {}]  }
   0x1   :  { %s2195_s14 = smov 0  }
   0x2 LB: > { %s25_s15 = sadd.s32 1, %s2165_s13  ;;  %p1696_p0 = scmp.ge.s32.totalorder %s2169_s14, 1  ;;  %s2169_s14 = sphi %s2195_s14, %s13_s14   ;;  %s2165_s13 = sphi %s2193_s13, %s2460_s13   ;;  %s2161_s12 = sphi %s2191_s12, %s2459_s12  }
   0x3   : > { %p27_p1 = scmp.ge.s32.totalorder %s25_s15, 2  ;;  %p168_p2 = scmp.lt.s32.totalorder %s2169_s14, 3 }
   0x5   : > { %s2462_s15 = smov (%p27_p1, %s25_s15), 0  ;;  %p169_p3 = pnand %p1696_p0, %p168_p2 }
   0x6   : > { %v1708_v0 = vld [vmem:[%s2456_s1 + $0x4] sm:$0xf] (!%p169_p3)  ;;  %vm267_vm0 = vcmask (!%p169_p3), 1043456   ;;  %v2215_v1 = vld [vmem:[%s2456_s1 + $0x10] sm:$0xf] (!%p169_p3)  ;;  %p202_p4 = scmp.lt.s32.totalorder (!%p169_p3), %s2161_s12, 1 }
   0x7   : > { %172 = sbr.rel (%p169_p3) target bundleno = 307 (0x133), region = 32  ;;  %1930 = vmatprep.subr.msk.mxu1 (!%p169_p3), %vm267_vm0, %v1708_v0  ;;  %1986 = vmatprep.subr.msk.mxu0 (!%p169_p3), %vm267_vm0, %v2215_v1  ;;  %v230_v2 = vld [vmem:[%s2456_s1] sm:$0xf] (!%p169_p3)  ;;  %v1781_v3 = vld [vmem:[%s2456_s1 + $0x14] sm:$0xf] (!%p169_p3)  ;;  %vm242_vm1 = vcmask (!%p169_p3), 31744  }
   0x8   : > { %1931 = vmatpush3.msk.msra.mxu1 (!%p169_p3), %vm267_vm0, %v1708_v0  ;;  %1987 = vmatpush3.msk.msra.mxu0 (!%p169_p3), %vm267_vm0, %v2215_v1  ;;  %v1799_v10 = vld [vmem:[%s2456_s1 + $0x18] sm:$0xf] (!%p169_p3)  ;;  %v1727_v11 = vld [vmem:[%s2456_s1 + $0x8] sm:$0xf] (!%p169_p3)  ;;  %v1817_v20 = vld [vmem:[%s2456_s1 + $0x1c] sm:$0xf] (!%p169_p3) }
   0x9   : > { %1944 = vmatprep.subr.msk.mxu1 (!%p169_p3), %vm267_vm0, %v230_v2  ;;  %2000 = vmatprep.subr.msk.mxu0 (!%p169_p3), %vm267_vm0, %v1781_v3  ;;  %v1745_v29 = vld [vmem:[%s2456_s1 + $0xc] sm:$0xf] (!%p169_p3)  ;;  %v1835_v35 = vld [vmem:[%s2456_s1 + $0x20] sm:$0xf] (!%p169_p3) }
   0xe   : > { %s2464_s12 = smov (!%p202_p4, %s2161_s12), 1 }
   0xf   : > { %s2122_s24 = smul.u32 576, %s2464_s12  ;;  %s1848_s11 = sshll.u32 %s2464_s12, 6 }
  0x10   : > { %s2428_s20 = scalar_lea.vmem %s2458_s3, %s1848_s11 }
  0x11   : > { %s2237_s27 = scalar_lea.vmem %s2455_s0, %s2122_s24 }
  0x12   : > { %v1700_v4 = vld [vmem:[%s2237_s27 + $0x90] sm:$0xff]  ;;  %v2242_v6 = vld [vmem:[%s2237_s27 + $0xa0] sm:$0xff] }
  0x13   : > { %v1755_v5 = vld [vmem:[%s2237_s27 + $0x1b0] sm:$0xff]  ;;  %1932 = vmatprep.mubr.msk.f32.mxu1 %vm242_vm1, %v1700_v4  ;;  %v1756_v7 = vld [vmem:[%s2237_s27 + $0x1c0] sm:$0xff] }
  0x14   : > { %1988 = vmatprep.mubr.msk.f32.mxu0 %vm242_vm1, %v1755_v5  ;;  %v2248_v8 = vld [vmem:[%s2237_s27 + $0xb0] sm:$0xff]  ;;  %1933 = vmatmul.mubr.msk.f32.vlgmr.msra.gmra.mrb[0].mxu1 %vm242_vm1, %v2242_v6  ;;  %v2263_v12 = vld [vmem:[%s2237_s27 + $0xc0] sm:$0xff] }
  0x15   : > { %v1757_v9 = vld [vmem:[%s2237_s27 + $0x1d0] sm:$0xff]  ;;  %1989 = vmatmul.mubr.msk.f32.vlgmr.msra.gmra.mrb[0].mxu0 %vm242_vm1, %v1756_v7  ;;  %1945 = vmatpush3.msk.msra.mxu1 %vm267_vm0, %v230_v2  ;;  %v1758_v13 = vld [vmem:[%s2237_s27 + $0x1e0] sm:$0xff] }
  0x16   : > { %2001 = vmatpush3.msk.msra.mxu0 %vm267_vm0, %v1781_v3  ;;  %1935 = vmatprep.mubr.msk.f32.mxu1 %vm242_vm1, %v2248_v8  ;;  %v2270_v14 = vld [vmem:[%s2237_s27 + $0xd0] sm:$0xff]  ;;  %v1773_v15 = vld [vmem:[%s2237_s27 + $0x121] sm:$0xff] }
  0x17   : > { %1991 = vmatprep.mubr.msk.f32.mxu0 %vm242_vm1, %v1757_v9  ;;  %2014 = vmatprep.subr.msk.mxu0 %vm267_vm0, %v1799_v10  ;;  %v2282_v16 = vld [vmem:[%s2237_s27 + $0xe0] sm:$0xff]  ;;  %v1774_v17 = vld [vmem:[%s2237_s27 + $0x131] sm:$0xff] }
  0x18   : > { %1958 = vmatprep.subr.msk.mxu1 %vm267_vm0, %v1727_v11  ;;  %1936 = vmatmul.mubr.msk.f32.gmra.mrb[2].mxu1 %vm242_vm1, %v2263_v12  ;;  %v2286_v18 = vld [vmem:[%s2237_s27 + $0xf0] sm:$0xff]  ;;  %v1775_v19 = vld [vmem:[%s2237_s27 + $0x141] sm:$0xff] }
  0x19   : > { %1992 = vmatmul.mubr.msk.f32.gmra.mrb[2].mxu0 %vm242_vm1, %v1758_v13  ;;  %1938 = vmatprep.mubr.msk.f32.mxu1 %vm242_vm1, %v2270_v14  ;;  %v2299_v21 = vld [vmem:[%s2237_s27 + $0x100] sm:$0xff]  ;;  %v1776_v22 = vld [vmem:[%s2237_s27 + $0x151] sm:$0xff] }
  0x1a   : > { %2002 = vmatprep.mubr.msk.f32.mxu0 %vm242_vm1, %v1773_v15  ;;  %v222_v23 = vld [vmem:[%s2237_s27] sm:$0xff]  ;;  %v223_v25 = vld [vmem:[%s2237_s27 + $0x10] sm:$0xff] }
  0x1b   : > { %v1777_v24 = vld [vmem:[%s2237_s27 + $0x161] sm:$0xff]  ;;  %v1778_v26 = vld [vmem:[%s2237_s27 + $0x171] sm:$0xff] }
  0x1c   : > { %1939 = vmatmul.mubr.msk.f32.gmra.mrb[4].mxu1 %vm242_vm1, %v2282_v16  ;;  %v224_v27 = vld [vmem:[%s2237_s27 + $0x20] sm:$0xff]  ;;  %v225_v30 = vld [vmem:[%s2237_s27 + $0x30] sm:$0xff] }
  0x1d   : > { %2003 = vmatmul.mubr.msk.f32.vlgmr.msra.gmra.mrb[0].mxu0 %vm242_vm1, %v1774_v17  ;;  %1941 = vmatprep.mubr.msk.f32.mxu1 %vm242_vm1, %v2286_v18  ;;  %v1779_v28 = vld [vmem:[%s2237_s27 + $0x181] sm:$0xff]  ;;  %v1780_v31 = vld [vmem:[%s2237_s27 + $0x191] sm:$0xff] }
  0x1e   : > { %2015 = vmatpush3.msk.msra.mxu0 %vm267_vm0, %v1799_v10  ;;  %2005 = vmatprep.mubr.msk.f32.mxu0 %vm242_vm1, %v1775_v19  ;;  %v226_v32 = vld [vmem:[%s2237_s27 + $0x40] sm:$0xff]  ;;  %v227_v33 = vld [vmem:[%s2237_s27 + $0x50] sm:$0xff] }
  0x1f   : > { %2028 = vmatprep.subr.msk.mxu0 %vm267_vm0, %v1817_v20  ;;  %v228_v34 = vld [vmem:[%s2237_s27 + $0x60] sm:$0xff]  ;;  %v229_v36 = vld [vmem:[%s2237_s27 + $0x70] sm:$0xff] }
  0x20   : > { %1942 = vmatmul.mubr.msk.f32.gmra.mrb[6].mxu1 %vm242_vm1, %v2299_v21  ;;  %v508_v37 = vld [vmem:[%s2237_s27 + $0x1] sm:$0xff]  ;;  %v509_v38 = vld [vmem:[%s2237_s27 + $0x11] sm:$0xff] }
  0x21   : > { %2006 = vmatmul.mubr.msk.f32.gmra.mrb[2].mxu0 %vm242_vm1, %v1776_v22  ;;  %1946 = vmatprep.mubr.msk.f32.mxu1 %vm242_vm1, %v222_v23  ;;  %v510_v39 = vld [vmem:[%s2237_s27 + $0x21] sm:$0xff]  ;;  %v511_v40 = vld [vmem:[%s2237_s27 + $0x31] sm:$0xff] }
  0x22   : > { %2008 = vmatprep.mubr.msk.f32.mxu0 %vm242_vm1, %v1777_v24  ;;  %v1798_v41 = vld [vmem:[%s2237_s27 + $0x80] sm:$0xff]  ;;  %v513_v43 = vld [vmem:[%s2237_s27 + $0x51] sm:$0xff] }
  0x23   : > { %v512_v42 = vld [vmem:[%s2237_s27 + $0x41] sm:$0xff]  ;;  %v515_v45 = vld [vmem:[%s2237_s27 + $0x71] sm:$0xff] }
  0x24   : > { %1947 = vmatmul.mubr.msk.f32.vlgmr.msra.gmra.mrb[0].mxu1 %vm242_vm1, %v223_v25  ;;  %v514_v44 = vld [vmem:[%s2237_s27 + $0x61] sm:$0xff]  ;;  %v1738_v47 = vld [vmem:[%s2237_s27 + $0x130] sm:$0xff] }
  0x25   : > { %2009 = vmatmul.mubr.msk.f32.gmra.mrb[4].mxu0 %vm242_vm1, %v1778_v26  ;;  %1959 = vmatpush3.msk.msra.mxu1 %vm267_vm0, %v1727_v11  ;;  %v1737_v46 = vld [vmem:[%s2237_s27 + $0x120] sm:$0xff]  ;;  %v1740_v49 = vld [vmem:[%s2237_s27 + $0x150] sm:$0xff] }
  0x26   : > { %1949 = vmatprep.mubr.msk.f32.mxu1 %vm242_vm1, %v224_v27  ;;  %2011 = vmatprep.mubr.msk.f32.mxu0 %vm242_vm1, %v1779_v28  ;;  %v1739_v48 = vld [vmem:[%s2237_s27 + $0x140] sm:$0xff]  ;;  %v1816_v50 = vld [vmem:[%s2237_s27 + $0x110] sm:$0xff] }
  0x27   : > { %1972 = vmatprep.subr.msk.mxu1 %vm267_vm0, %v1745_v29  ;;  %v1741_v51 = vld [vmem:[%s2237_s27 + $0x160] sm:$0xff]  ;;  %v1742_v52 = vld [vmem:[%s2237_s27 + $0x170] sm:$0xff] }
  0x28   : > { %1950 = vmatmul.mubr.msk.f32.gmra.mrb[2].mxu1 %vm242_vm1, %v225_v30  ;;  %v1743_v53 = vld [vmem:[%s2237_s27 + $0x180] sm:$0xff]  ;;  %v1744_v54 = vld [vmem:[%s2237_s27 + $0x190] sm:$0xff] }
  0x29   : > { %2012 = vmatmul.mubr.msk.f32.gmra.mrb[6].mxu0 %vm242_vm1, %v1780_v31  ;;  %1952 = vmatprep.mubr.msk.f32.mxu1 %vm242_vm1, %v226_v32  ;;  %v1759_v55 = vld [vmem:[%s2237_s27 + $0x1f0] sm:$0xff]  ;;  %v1760_v56 = vld [vmem:[%s2237_s27 + $0x200] sm:$0xff] }
  0x2a   : > { %2016 = vmatprep.mubr.msk.f32.mxu0 %vm242_vm1, %v223_v25  ;;  %v1761_v57 = vld [vmem:[%s2237_s27 + $0x210] sm:$0xff]  ;;  %v1762_v58 = vld [vmem:[%s2237_s27 + $0x220] sm:$0xff] }
  0x2b   : > { %v1834_v59 = vld [vmem:[%s2237_s27 + $0x81] sm:$0xff] }
  0x2c   : > { %1953 = vmatmul.mubr.msk.f32.gmra.mrb[4].mxu1 %vm242_vm1, %v227_v33 }
  0x2d   : > { %2017 = vmatmul.mubr.msk.f32.vlgmr.msra.gmra.mrb[0].mxu0 %vm242_vm1, %v224_v27  ;;  %1955 = vmatprep.mubr.msk.f32.mxu1 %vm242_vm1, %v228_v34 }
  0x2e   : > { %2029 = vmatpush3.msk.msra.mxu0 %vm267_vm0, %v1817_v20  ;;  %2019 = vmatprep.mubr.msk.f32.mxu0 %vm242_vm1, %v225_v30 }
  0x2f   : > { %2042 = vmatprep.subr.msk.mxu0 %vm267_vm0, %v1835_v35 }
  0x30   : > { %1956 = vmatmul.mubr.msk.f32.gmra.mrb[6].mxu1 %vm242_vm1, %v229_v36 }
  0x31   : > { %2020 = vmatmul.mubr.msk.f32.gmra.mrb[2].mxu0 %vm242_vm1, %v226_v32  ;;  %1960 = vmatprep.mubr.msk.f32.mxu1 %vm242_vm1, %v508_v37 }
  0x32   : > { %2022 = vmatprep.mubr.msk.f32.mxu0 %vm242_vm1, %v227_v33 }
  0x34   : > { %1961 = vmatmul.mubr.msk.f32.vlgmr.msra.gmra.mrb[0].mxu1 %vm242_vm1, %v509_v38 }
  0x35   : > { %2023 = vmatmul.mubr.msk.f32.gmra.mrb[4].mxu0 %vm242_vm1, %v228_v34  ;;  %1973 = vmatpush3.msk.msra.mxu1 %vm267_vm0, %v1745_v29 }
  0x36   : > { %1963 = vmatprep.mubr.msk.f32.mxu1 %vm242_vm1, %v510_v39  ;;  %2025 = vmatprep.mubr.msk.f32.mxu0 %vm242_vm1, %v229_v36 }
  0x37   : > { %2056 = vmatprep.subr.msk.mxu1 %vm267_vm0, %v2215_v1 }
  0x38   : > { %1964 = vmatmul.mubr.msk.f32.gmra.mrb[2].mxu1 %vm242_vm1, %v511_v40 }
  0x39   : > { %2026 = vmatmul.mubr.msk.f32.gmra.mrb[6].mxu0 %vm242_vm1, %v1798_v41  ;;  %1966 = vmatprep.mubr.msk.f32.mxu1 %vm242_vm1, %v512_v42 }
  0x3a   : > { %2030 = vmatprep.mubr.msk.f32.mxu0 %vm242_vm1, %v2242_v6 }
  0x3c   : > { %1967 = vmatmul.mubr.msk.f32.gmra.mrb[4].mxu1 %vm242_vm1, %v513_v43 }
  0x3d   : > { %2031 = vmatmul.mubr.msk.f32.vlgmr.msra.gmra.mrb[0].mxu0 %vm242_vm1, %v2248_v8  ;;  %1969 = vmatprep.mubr.msk.f32.mxu1 %vm242_vm1, %v514_v44 }
  0x3e   : > { %2043 = vmatpush3.msk.msra.mxu0 %vm267_vm0, %v1835_v35  ;;  %2033 = vmatprep.mubr.msk.f32.mxu0 %vm242_vm1, %v2263_v12 }
  0x40   : > { %1970 = vmatmul.mubr.msk.f32.gmra.mrb[6].mxu1 %vm242_vm1, %v515_v45 }
  0x41   : > { %2034 = vmatmul.mubr.msk.f32.gmra.mrb[2].mxu0 %vm242_vm1, %v2270_v14  ;;  %1974 = vmatprep.mubr.msk.f32.mxu1 %vm242_vm1, %v1737_v46 }
  0x42   : > { %2036 = vmatprep.mubr.msk.f32.mxu0 %vm242_vm1, %v2282_v16 }
  0x44   : > { %1975 = vmatmul.mubr.msk.f32.vlgmr.msra.gmra.mrb[0].mxu1 %vm242_vm1, %v1738_v47 }
  0x45   : > { %2037 = vmatmul.mubr.msk.f32.gmra.mrb[4].mxu0 %vm242_vm1, %v2286_v18  ;;  %2057 = vmatpush3.msk.msra.mxu1 %vm267_vm0, %v2215_v1  ;;  %v1845_v1 = vld [vmem:[%s2457_s2] ss:$0 sm:$0xff] }
  0x46   : > { %1977 = vmatprep.mubr.msk.f32.mxu1 %vm242_vm1, %v1739_v48  ;;  %2039 = vmatprep.mubr.msk.f32.mxu0 %vm242_vm1, %v2299_v21 }
  0x48   : > { %1978 = vmatmul.mubr.msk.f32.gmra.mrb[2].mxu1 %vm242_vm1, %v1740_v49 }
  0x49   : > { %2040 = vmatmul.mubr.msk.f32.gmra.mrb[6].mxu0 %vm242_vm1, %v1816_v50  ;;  %1980 = vmatprep.mubr.msk.f32.mxu1 %vm242_vm1, %v1741_v51 }
  0x4a   : > { %2044 = vmatprep.mubr.msk.f32.mxu0 %vm242_vm1, %v509_v38 }
  0x4c   : > { %1981 = vmatmul.mubr.msk.f32.gmra.mrb[4].mxu1 %vm242_vm1, %v1742_v52 }
  0x4d   : > { %2045 = vmatmul.mubr.msk.f32.vlgmr.msra.gmra.mrb[0].mxu0 %vm242_vm1, %v510_v39  ;;  %1983 = vmatprep.mubr.msk.f32.mxu1 %vm242_vm1, %v1743_v53 }
  0x4e   : > { %2047 = vmatprep.mubr.msk.f32.mxu0 %vm242_vm1, %v511_v40 }
  0x50   : > { %1984 = vmatmul.mubr.msk.f32.gmra.mrb[6].mxu1 %vm242_vm1, %v1744_v54 }
  0x51   : > { %2048 = vmatmul.mubr.msk.f32.gmra.mrb[2].mxu0 %vm242_vm1, %v512_v42  ;;  %1994 = vmatprep.mubr.msk.f32.mxu1 %vm242_vm1, %v1759_v55 }
  0x52   : > { %2050 = vmatprep.mubr.msk.f32.mxu0 %vm242_vm1, %v513_v43 }
  0x54   : > { %1995 = vmatmul.mubr.msk.f32.vlgmr.msra.gmra.mrb[4].mxu1 %vm242_vm1, %v1760_v56 }
  0x55   : > { %2051 = vmatmul.mubr.msk.f32.gmra.mrb[4].mxu0 %vm242_vm1, %v514_v44  ;;  %1997 = vmatprep.mubr.msk.f32.mxu1 %vm242_vm1, %v1761_v57 }
  0x56   : > { %2053 = vmatprep.mubr.msk.f32.mxu0 %vm242_vm1, %v515_v45 }
  0x58   : > { %1998 = vmatmul.mubr.msk.f32.gmra.mrb[6].mxu1 %vm242_vm1, %v1762_v58 }
  0x59   : > { %2054 = vmatmul.mubr.msk.f32.gmra.mrb[6].mxu0 %vm242_vm1, %v1834_v59 }
 0x117   : > { %v1976_v60 = vpop.f32.mrb[0].mxu1 }
 0x118   : > { %v762_v61 = vpop.f32.mrb[1].mxu1 }
 0x11b   : > { %v1979_v62 = vpop.f32.mrb[2].mxu1 }
 0x11c   : > { %v772_v63 = vpop.f32.mrb[3].mxu1 }
 0x120   : > { %v2046_v0 = vpop.f32.mrb[0].mxu0 }
 0x121   : > { %v2058_v2 = vadd.f32 %v2046_v0, %v1976_v60  ;;  %v1515_v3 = vpop.f32.mrb[1].mxu0 }
 0x122   : > { %v2059_v4 = vadd.f32 %v1515_v3, %v762_v61 }
 0x123   : > { %v1570_v5 = vadd.f32 %v2058_v2, %v1845_v1 }
 0x124   : > { %v1569_v6 = vadd.f32 %v2059_v4, %v1845_v1  ;;  %v2049_v7 = vpop.f32.mrb[2].mxu0 }
 0x125   : > { %1578 = vst.msk [vmem:[%s2428_s20 + $0x8] sm:$0xff] %vm242_vm1, %v1570_v5  ;;  %v2060_v8 = vadd.f32 %v2049_v7, %v1979_v62  ;;  %v1525_v9 = vpop.f32.mrb[3].mxu0 }
 0x126   : > { %1577 = vst.msk [vmem:[%s2428_s20] sm:$0xff] %vm242_vm1, %v1569_v6  ;;  %v2061_v10 = vadd.f32 %v1525_v9, %v772_v63 }
 0x127   : > { %v1572_v11 = vadd.f32 %v2060_v8, %v1845_v1  ;;  %v1996_v13 = vpop.f32.mrb[4].mxu1 }
 0x128   : > { %v1571_v12 = vadd.f32 %v2061_v10, %v1845_v1  ;;  %v2052_v14 = vpop.f32.mrb[4].mxu0  ;;  %v933_v16 = vpop.f32.mrb[5].mxu1 }
 0x129   : > { %1580 = vst.msk [vmem:[%s2428_s20 + $0x18] sm:$0xff] %vm242_vm1, %v1572_v11  ;;  %v2062_v15 = vadd.f32 %v2052_v14, %v1996_v13  ;;  %v1535_v17 = vpop.f32.mrb[5].mxu0 }
 0x12a   : > { %1579 = vst.msk [vmem:[%s2428_s20 + $0x10] sm:$0xff] %vm242_vm1, %v1571_v12  ;;  %v2063_v18 = vadd.f32 %v1535_v17, %v933_v16 }
 0x12b   : > { %v1574_v19 = vadd.f32 %v2062_v15, %v1845_v1  ;;  %v1999_v21 = vpop.f32.mrb[6].mxu1 }
 0x12c   : > { %v1573_v20 = vadd.f32 %v2063_v18, %v1845_v1  ;;  %v2055_v22 = vpop.f32.mrb[6].mxu0  ;;  %v943_v24 = vpop.f32.mrb[7].mxu1 }
 0x12d   : > { %1582 = vst.msk [vmem:[%s2428_s20 + $0x28] sm:$0xff] %vm242_vm1, %v1574_v19  ;;  %v2064_v23 = vadd.f32 %v2055_v22, %v1999_v21  ;;  %v1545_v25 = vpop.f32.mrb[7].mxu0 }
 0x12e   : > { %1581 = vst.msk [vmem:[%s2428_s20 + $0x20] sm:$0xff] %vm242_vm1, %v1573_v20  ;;  %v2065_v26 = vadd.f32 %v1545_v25, %v943_v24 }
 0x12f   : > { %v1576_v27 = vadd.f32 %v2064_v23, %v1845_v1 }
 0x130   : > { %v1575_v28 = vadd.f32 %v2065_v26, %v1845_v1 }
 0x131   : > { %1584 = vst.msk [vmem:[%s2428_s20 + $0x38] sm:$0xff] %vm242_vm1, %v1576_v27 }
 0x132   : > { %1583 = vst.msk [vmem:[%s2428_s20 + $0x30] sm:$0xff] %vm242_vm1, %v1575_v28 }
 0x133 PF: > { %s13_s14 = sadd.s32 1, %s2169_s14   ;;  %s2459_s12 = smov %s2165_s13 }
 0x134   : > { %p10_p5 = scmp.ge.s32.totalorder %s13_s14, 4   ;;  %s2460_s13 = smov %s2462_s15 }
 0x136   :  { %12 = sbr.rel (!%p10_p5) target bundleno = 2 (0x2), region = 81 }

</bundles_post_ra>
